<compile_context>
chip_gen: v7x
topology: tpu7x:2x2x1
jax: 0.10.0
libtpu: 0.0.40
codegen_flags: <defaults>
</compile_context>

<pallas_src>
import math

import jax
import jax.numpy as jnp
from jax.experimental import pallas as pl
from jax.experimental.pallas import tpu as pltpu

N_JOINTS_ALL = 24            # SMPL joints incl. global orientation
N_JOINTS = 23                # joints fed to the pose discriminator (root dropped)
ROT_DIM = 9                  # flattened 3x3 rotation matrix
C_HID = 32
FULL_DIM = N_JOINTS * C_HID  # 736 = 23 * 32

SLAB_ROWS = 72               # packed-weight slab rows (padded to a multiple of 8)
OUT_W = 32                   # packed output width: 23 pose + 1 full + 1 shape + pad


def _round_up(x, m):
    return ((x + m - 1) // m) * m


def _sigmoid(x):
    # Exact sigmoid (exp on EUP, one divide); negligible cost at this size and
    # keeps the outputs usable for loss computation.
    return 1.0 / (1.0 + jnp.exp(-x))


# ----------------------------------------------------------------------------
# Fused kernel: rodrigues -> folded pose/full heads -> shape MLP -> packed out.
# ----------------------------------------------------------------------------
def _disc_kernel(aa_ref, betas_ref, w_ref, out_ref):
    f32 = jnp.float32
    eps = 1e-8

    # ---- batch_rodrigues on lane-dense (Bt, 23) planes -------------------------
    # angle = ||theta + 1e-8|| matches HMR's torch.norm(param + 1e-8) convention.
    ax = aa_ref[0]                                   # (Bt, 23)
    ay = aa_ref[1]
    az = aa_ref[2]
    axe = ax + eps
    aye = ay + eps
    aze = az + eps
    sumsq = axe * axe + aye * aye + aze * aze
    angle = jnp.sqrt(sumsq)                          # (Bt, 23)
    inv_angle = jax.lax.rsqrt(jnp.maximum(sumsq, 1e-24))   # EUP rsqrt, guarded
    nx = ax * inv_angle
    ny = ay * inv_angle
    nz = az * inv_angle
    half = 0.5 * angle
    w = jnp.cos(half)
    s = jnp.sin(half)
    qx = s * nx
    qy = s * ny
    qz = s * nz
    inv_qn = jax.lax.rsqrt(w * w + qx * qx + qy * qy + qz * qz)  # quat2mat norm
    w = w * inv_qn
    qx = qx * inv_qn
    qy = qy * inv_qn
    qz = qz * inv_qn

    w2, x2, y2, z2 = w * w, qx * qx, qy * qy, qz * qz
    wx, wy, wz = w * qx, w * qy, w * qz
    xy, xz, yz = qx * qy, qx * qz, qy * qz

    # Nine row-major rotation-matrix element planes, each (Bt, 23).
    rot = (w2 + x2 - y2 - z2, 2 * xy - 2 * wz, 2 * wy + 2 * xz,
           2 * wz + 2 * xy, w2 - x2 + y2 - z2, 2 * yz - 2 * wx,
           2 * xz - 2 * wy, 2 * wx + 2 * yz, w2 - x2 - y2 + z2)

    # ---- packed-weight slab views ----------------------------------------------
    ap = w_ref[0:9, 0:N_JOINTS]                      # (9, 23)   A_pose
    bp = w_ref[9:10, 0:N_JOINTS]                     # (1, 23)   b_pose
    af = w_ref[10:19, 0:N_JOINTS]                    # (9, 23)   A_full
    fconst = w_ref[19:20, 0:1]                       # (1, 1)    full-pose constant
    sw0 = w_ref[20:30, 0:C_HID]                      # (10, 32)
    sb0 = w_ref[30:31, 0:C_HID]                      # (1, 32)
    sb1 = w_ref[31:32, 0:C_HID]                      # (1, 32)
    sw1 = w_ref[32:64, 0:C_HID]                      # (32, 32)
    sw2r = w_ref[64:65, 0:C_HID]                     # (1, 32)
    sb2 = w_ref[65:66, 0:1]                          # (1, 1)

    # ---- folded pose + full-pose heads: 18 FMAs on (Bt, 23) planes -------------
    pose_logit = bp + rot[0] * ap[0:1, :]
    full_acc = rot[0] * af[0:1, :]
    for e in range(1, ROT_DIM):
        pose_logit = pose_logit + rot[e] * ap[e:e + 1, :]
        full_acc = full_acc + rot[e] * af[e:e + 1, :]
    full_logit = jnp.sum(full_acc, axis=1, keepdims=True) + fconst   # (Bt, 1)

    pose_sig = _sigmoid(pose_logit)                  # (Bt, 23)
    full_sig = _sigmoid(full_logit)                  # (Bt, 1)

    # ---- ShapeDiscriminator: Linear-ReLU-Linear-ReLU-Linear-Sigmoid ------------
    b = betas_ref[...]                               # (Bt, 10)
    hs = jnp.dot(b, sw0, preferred_element_type=f32) + sb0
    hs = jnp.maximum(hs, 0.0)
    hs = jnp.dot(hs, sw1, preferred_element_type=f32) + sb1
    hs = jnp.maximum(hs, 0.0)
    shape_logit = jnp.sum(hs * sw2r, axis=1, keepdims=True) + sb2    # (Bt, 1)
    shape_sig = _sigmoid(shape_logit)

    # ---- single packed, lane-dense output store --------------------------------
    bt = pose_sig.shape[0]
    pad = jnp.zeros((bt, OUT_W - N_JOINTS - 2), f32)
    out_ref[...] = jnp.concatenate([pose_sig, full_sig, shape_sig, pad], axis=1)


# ----------------------------------------------------------------------------
# Discriminator.forward (eval mode)
# ----------------------------------------------------------------------------
def discriminator_forward(thetas, wslab):
    betas = thetas["betas"].astype(jnp.float32)                       # (B, 10)
    poses = jnp.concatenate(
        [thetas["root_orient"], thetas["pose_body"], thetas["pose_hand"]], axis=1
    ).astype(jnp.float32)                                             # (B, 72)
    B = betas.shape[0]

    # Drop the root joint; re-layout to lane-dense (3, B, 23) planes.
    aa = poses.reshape(B, N_JOINTS_ALL, 3)[:, 1:, :]                  # (B, 23, 3)
    aa3 = jnp.transpose(aa, (2, 0, 1))                                # (3, B, 23)

    # Fixed multiple-of-8 batch tile; pad B so grid = Bp // block_b always works.
    # For B >= 16 force >= 2 grid steps so v7x can shard the 'parallel' axis
    # across both TensorCores; cap block_b to stay small in v7x's 64 MiB VMEM
    # while still amortizing per-step overhead.
    if B < 16:
        block_b = _round_up(B, 8)
    else:
        block_b = min(512, _round_up(pl.cdiv(B, 2), 8))
    Bp = _round_up(B, block_b)
    grid = (Bp // block_b,)

    if Bp != B:
        aa3 = jnp.pad(aa3, ((0, 0), (0, Bp - B), (0, 0)))
        betas_p = jnp.pad(betas, ((0, Bp - B), (0, 0)))
    else:
        betas_p = betas

    # Advisory cost estimate (tiny kernel: mostly rodrigues + 18 FMAs per row).
    flops = int(Bp * (N_JOINTS * (45 + 4 * ROT_DIM)
                      + 2 * (10 * C_HID + C_HID * C_HID + C_HID) + 128))
    transcendentals = int(Bp * (N_JOINTS * 5 + 3))
    bytes_accessed = int((Bp * (3 * N_JOINTS + 10 + OUT_W) + SLAB_ROWS * 128) * 4)

    out = pl.pallas_call(
        _disc_kernel,
        grid=grid,
        in_specs=[
            pl.BlockSpec((3, block_b, N_JOINTS), lambda i: (0, i, 0)),
            pl.BlockSpec((block_b, 10), lambda i: (i, 0)),
            pl.BlockSpec((SLAB_ROWS, 128), lambda i: (0, 0)),
        ],
        out_specs=pl.BlockSpec((block_b, OUT_W), lambda i: (i, 0)),
        out_shape=jax.ShapeDtypeStruct((Bp, OUT_W), jnp.float32),
        compiler_params=pltpu.CompilerParams(
            dimension_semantics=("parallel",),
            vmem_limit_bytes=16 * 1024 * 1024),
        cost_estimate=pl.CostEstimate(
            flops=flops, transcendentals=transcendentals,
            bytes_accessed=bytes_accessed),
    )(aa3, betas_p, wslab)

    pose_disc = out[:B, 0:N_JOINTS]
    full_disc = out[:B, N_JOINTS:N_JOINTS + 1]
    shape_disc = out[:B, N_JOINTS + 1:N_JOINTS + 2]
    return pose_disc, full_disc, shape_disc


# ----------------------------------------------------------------------------
# Parameters: torch-layout init + ONE-TIME fold/pack into the kernel weight slab.
# ----------------------------------------------------------------------------
def init_params(key):
    """Deterministic torch-style params: Linear/Conv weights stored (out, in)."""
    def lin(k, fan_in, fan_out):
        bound = 1.0 / math.sqrt(fan_in)
        kw, kb = jax.random.split(k)
        w = jax.random.uniform(kw, (fan_out, fan_in), jnp.float32, -bound, bound)
        b = jax.random.uniform(kb, (fan_out,), jnp.float32, -bound, bound)
        return w, b

    ks = jax.random.split(key, 10)
    bound32 = 1.0 / math.sqrt(C_HID)
    return {
        # PoseDiscriminator 1x1 convs
        "conv0": lin(ks[0], ROT_DIM, C_HID),
        "conv1": lin(ks[1], C_HID, C_HID),
        "conv2": lin(ks[2], C_HID, C_HID),
        # 23 per-joint Linear(32, 1) heads packed as (23, 32) / (23,)
        "fc_w": jax.random.uniform(ks[3], (N_JOINTS, C_HID), jnp.float32, -bound32, bound32),
        "fc_b": jax.random.uniform(ks[4], (N_JOINTS,), jnp.float32, -bound32, bound32),
        # FullPoseDiscriminator
        "full0": lin(ks[5], FULL_DIM, C_HID),
        "full1": lin(ks[6], C_HID, 1),
        # ShapeDiscriminator
        "shape0": lin(ks[7], 10, C_HID),
        "shape1": lin(ks[8], C_HID, C_HID),
        "shape2": lin(ks[9], C_HID, 1),
    }


def preprocess_params(p):
    """Fold all pose-path linear chains and pack every weight into one (72,128) slab."""
    # Collapse conv0 -> conv1 -> conv2 (no nonlinearity between them).
    (w0, b0), (w1, b1), (w2, b2) = p["conv0"], p["conv1"], p["conv2"]
    w0t, w1t, w2t = w0.T, w1.T, w2.T                      # (in, out) layout
    weff = w0t @ w1t @ w2t                                # (9, 32)
    beff = (b0 @ w1t + b1) @ w2t + b2                     # (32,)

    # Per-joint heads folded onto rot9: pose_logit = rot9 . A_pose + b_pose
    fcw, fcb = p["fc_w"], p["fc_b"]                       # (23, 32), (23,)
    a_pose = weff @ fcw.T                                 # (9, 23)
    b_pose = fcw @ beff + fcb                             # (23,)

    # FullPoseDiscriminator: Linear(736,32) -> Linear(32,1) (no activation),
    # torch flatten order of internal (B,32,1,23).view(B,-1) is index c*23 + j.
    fw0, fb0 = p["full0"]                                 # (32, 736), (32,)
    fw1, fb1 = p["full1"]                                 # (1, 32),  (1,)
    v_flat = fw0.T @ fw1[0]                               # (736,) indexed by c*23+j
    vfull = v_flat.reshape(C_HID, N_JOINTS).T             # (23, 32)
    bfull = jnp.dot(fb0, fw1[0]) + fb1[0]
    a_full = weff @ vfull.T                               # (9, 23)
    full_const = jnp.sum(vfull @ beff) + bfull            # scalar

    sw0, sb0 = p["shape0"]                                # (32, 10), (32,)
    sw1, sb1 = p["shape1"]                                # (32, 32), (32,)
    sw2, sb2 = p["shape2"]                                # (1, 32),  (1,)

    slab = jnp.zeros((SLAB_ROWS, 128), jnp.float32)
    slab = slab.at[0:9, 0:N_JOINTS].set(a_pose)
    slab = slab.at[9, 0:N_JOINTS].set(b_pose)
    slab = slab.at[10:19, 0:N_JOINTS].set(a_full)
    slab = slab.at[19, 0].set(full_const)
    slab = slab.at[20:30, 0:C_HID].set(sw0.T)             # (10, 32)
    slab = slab.at[30, 0:C_HID].set(sb0)
    slab = slab.at[31, 0:C_HID].set(sb1)
    slab = slab.at[32:64, 0:C_HID].set(sw1.T)             # (32, 32)
    slab = slab.at[64, 0:C_HID].set(sw2[0])               # (32,)
    slab = slab.at[65, 0].set(sb2[0])
    return slab


# ----------------------------------------------------------------------------
# Pure-JAX reference of the torch module (eval mode) for validation.
# ----------------------------------------------------------------------------
def _batch_rodrigues_ref(aa):                              # (N, 3) -> (N, 9)
    eps = 1e-8
    angle = jnp.sqrt(jnp.sum((aa + eps) ** 2, axis=1, keepdims=True))
    normalized = aa / angle
    half = 0.5 * angle
    w = jnp.cos(half)
    xyz = jnp.sin(half) * normalized
    quat = jnp.concatenate([w, xyz], axis=1)
    quat = quat / jnp.linalg.norm(quat, axis=1, keepdims=True)
    w, x, y, z = quat[:, 0], quat[:, 1], quat[:, 2], quat[:, 3]
    w2, x2, y2, z2 = w * w, x * x, y * y, z * z
    wx, wy, wz = w * x, w * y, w * z
    xy, xz, yz = x * y, x * z, y * z
    return jnp.stack([
        w2 + x2 - y2 - z2, 2 * xy - 2 * wz, 2 * wy + 2 * xz,
        2 * wz + 2 * xy, w2 - x2 + y2 - z2, 2 * yz - 2 * wx,
        2 * xz - 2 * wy, 2 * wx + 2 * yz, w2 - x2 - y2 + z2], axis=1)


def _reference_forward(thetas, p):
    betas = thetas["betas"]
    poses = jnp.concatenate(
        [thetas["root_orient"], thetas["pose_body"], thetas["pose_hand"]], axis=1)
    B = betas.shape[0]
    rot = _batch_rodrigues_ref(poses.reshape(-1, 3)).reshape(B, N_JOINTS_ALL, ROT_DIM)[:, 1:, :]
    (w0, b0), (w1, b1), (w2, b2) = p["conv0"], p["conv1"], p["conv2"]
    h = rot @ w0.T + b0
    h = h @ w1.T + b1
    h = h @ w2.T + b2                                       # internal[b, c, 0, j] == h[b, j, c]
    pose = jax.nn.sigmoid(jnp.einsum("bjc,jc->bj", h, p["fc_w"]) + p["fc_b"])
    full_in = jnp.transpose(h, (0, 2, 1)).reshape(B, FULL_DIM)   # torch .view order: c*23+j
    (fw0, fb0), (fw1, fb1) = p["full0"], p["full1"]
    full = jax.nn.sigmoid((full_in @ fw0.T + fb0) @ fw1.T + fb1)
    (sw0, sb0), (sw1, sb1), (sw2, sb2) = p["shape0"], p["shape1"], p["shape2"]
    hs = jax.nn.relu(betas @ sw0.T + sb0)
    hs = jax.nn.relu(hs @ sw1.T + sb1)
    shape = jax.nn.sigmoid(hs @ sw2.T + sb2)
    return pose, full, shape


if __name__ == "__main__":
    key = jax.random.PRNGKey(0)
    key_params, kbeta, kroot, kbody, khand = jax.random.split(key, 5)
    B = 2
    thetas = {
        "betas": jax.random.normal(kbeta, (B, 10), jnp.float32),
        "root_orient": jax.random.normal(kroot, (B, 3), jnp.float32) * 0.3,
        "pose_body": jax.random.normal(kbody, (B, 63), jnp.float32) * 0.3,
        "pose_hand": jax.random.normal(khand, (B, 6), jnp.float32) * 0.3,
    }
    params = init_params(key_params)
    wslab = preprocess_params(params)          # once, outside the per-step path

    fwd = jax.jit(discriminator_forward)
    pose_d, full_d, shape_d = fwd(thetas, wslab)
    jax.block_until_ready((pose_d, full_d, shape_d))

    assert pose_d.shape == (B, N_JOINTS)
    assert full_d.shape == (B, 1)
    assert shape_d.shape == (B, 1)
    assert bool(jnp.all(jnp.isfinite(pose_d)))
    assert bool(jnp.all(jnp.isfinite(full_d)))
    assert bool(jnp.all(jnp.isfinite(shape_d)))

    # Validate against a pure-JAX reference of the (non-collapsed) torch module.
    ref_pose, ref_full, ref_shape = _reference_forward(thetas, params)
    tol = 5e-4  # fp reassociation from folding the linear chains; exact sigmoid
    assert bool(jnp.allclose(pose_d, ref_pose, atol=tol))
    assert bool(jnp.allclose(full_d, ref_full, atol=tol))
    assert bool(jnp.allclose(shape_d, ref_shape, atol=tol))

    print("KERNEL_OK")
</pallas_src>

<mosaic_0001>
module attributes {stable_mosaic.version = 11 : i64} {
  func.func @_disc_kernel(%arg0: i32, %arg1: memref<3x8x23xf32, #tpu.memory_space<vmem>>, %arg2: memref<8x10xf32, #tpu.memory_space<vmem>>, %arg3: memref<72x128xf32, #tpu.memory_space<vmem>>, %arg4: memref<8x32xf32, #tpu.memory_space<vmem>>) attributes {dimension_semantics = [#tpu.dimension_semantics<parallel>], iteration_bounds = array<i64: 1>, scalar_prefetch = 0 : i64, scratch_operands = 0 : i64, tpu.core_type = #tpu.core_type<tc>, window_params = [{transform_indices = @transform_0, window_bounds = array<i64: 3, 8, 23>}, {transform_indices = @transform_1, window_bounds = array<i64: 8, 10>}, {pipeline_mode = #tpu.pipeline_mode<synchronous>, transform_indices = @transform_2, window_bounds = array<i64: 72, 128>}, {transform_indices = @transform_3, window_bounds = array<i64: 8, 32>}]} {
    %c0 = arith.constant 0 : index
    %c0_0 = arith.constant 0 : index
    %c0_1 = arith.constant 0 : index
    %0 = vector.load %arg1[%c0, %c0_0, %c0_1] : memref<3x8x23xf32, #tpu.memory_space<vmem>>, vector<1x8x23xf32>
    %1 = vector.shape_cast %0 : vector<1x8x23xf32> to vector<8x23xf32>
    %c1 = arith.constant 1 : index
    %c0_2 = arith.constant 0 : index
    %c0_3 = arith.constant 0 : index
    %2 = vector.load %arg1[%c1, %c0_2, %c0_3] : memref<3x8x23xf32, #tpu.memory_space<vmem>>, vector<1x8x23xf32>
    %3 = vector.shape_cast %2 : vector<1x8x23xf32> to vector<8x23xf32>
    %c2 = arith.constant 2 : index
    %c0_4 = arith.constant 0 : index
    %c0_5 = arith.constant 0 : index
    %4 = vector.load %arg1[%c2, %c0_4, %c0_5] : memref<3x8x23xf32, #tpu.memory_space<vmem>>, vector<1x8x23xf32>
    %5 = vector.shape_cast %4 : vector<1x8x23xf32> to vector<8x23xf32>
    %cst = arith.constant 9.99999993E-9 : f32
    %6 = vector.broadcast %cst : f32 to vector<8x23xf32>
    %7 = arith.addf %1, %6 : vector<8x23xf32>
    %cst_6 = arith.constant 9.99999993E-9 : f32
    %8 = vector.broadcast %cst_6 : f32 to vector<8x23xf32>
    %9 = arith.addf %3, %8 : vector<8x23xf32>
    %cst_7 = arith.constant 9.99999993E-9 : f32
    %10 = vector.broadcast %cst_7 : f32 to vector<8x23xf32>
    %11 = arith.addf %5, %10 : vector<8x23xf32>
    %12 = arith.mulf %7, %7 : vector<8x23xf32>
    %13 = arith.mulf %9, %9 : vector<8x23xf32>
    %14 = arith.addf %12, %13 : vector<8x23xf32>
    %15 = arith.mulf %11, %11 : vector<8x23xf32>
    %16 = arith.addf %14, %15 : vector<8x23xf32>
    %17 = math.sqrt %16 : vector<8x23xf32>
    %cst_8 = arith.constant 1.000000e-24 : f32
    %18 = vector.broadcast %cst_8 : f32 to vector<8x23xf32>
    %19 = arith.maximumf %16, %18 : vector<8x23xf32>
    %20 = math.rsqrt %19 : vector<8x23xf32>
    %21 = arith.mulf %1, %20 : vector<8x23xf32>
    %22 = arith.mulf %3, %20 : vector<8x23xf32>
    %23 = arith.mulf %5, %20 : vector<8x23xf32>
    %cst_9 = arith.constant 5.000000e-01 : f32
    %24 = vector.broadcast %cst_9 : f32 to vector<8x23xf32>
    %25 = arith.mulf %24, %17 : vector<8x23xf32>
    %26 = math.cos %25 : vector<8x23xf32>
    %27 = math.sin %25 : vector<8x23xf32>
    %28 = arith.mulf %27, %21 : vector<8x23xf32>
    %29 = arith.mulf %27, %22 : vector<8x23xf32>
    %30 = arith.mulf %27, %23 : vector<8x23xf32>
    %31 = arith.mulf %26, %26 : vector<8x23xf32>
    %32 = arith.mulf %28, %28 : vector<8x23xf32>
    %33 = arith.addf %31, %32 : vector<8x23xf32>
    %34 = arith.mulf %29, %29 : vector<8x23xf32>
    %35 = arith.addf %33, %34 : vector<8x23xf32>
    %36 = arith.mulf %30, %30 : vector<8x23xf32>
    %37 = arith.addf %35, %36 : vector<8x23xf32>
    %38 = math.rsqrt %37 : vector<8x23xf32>
    %39 = arith.mulf %26, %38 : vector<8x23xf32>
    %40 = arith.mulf %28, %38 : vector<8x23xf32>
    %41 = arith.mulf %29, %38 : vector<8x23xf32>
    %42 = arith.mulf %30, %38 : vector<8x23xf32>
    %43 = arith.mulf %39, %39 : vector<8x23xf32>
    %44 = arith.mulf %40, %40 : vector<8x23xf32>
    %45 = arith.mulf %41, %41 : vector<8x23xf32>
    %46 = arith.mulf %42, %42 : vector<8x23xf32>
    %47 = arith.mulf %39, %40 : vector<8x23xf32>
    %48 = arith.mulf %39, %41 : vector<8x23xf32>
    %49 = arith.mulf %39, %42 : vector<8x23xf32>
    %50 = arith.mulf %40, %41 : vector<8x23xf32>
    %51 = arith.mulf %40, %42 : vector<8x23xf32>
    %52 = arith.mulf %41, %42 : vector<8x23xf32>
    %53 = arith.addf %43, %44 : vector<8x23xf32>
    %54 = arith.subf %53, %45 : vector<8x23xf32>
    %55 = arith.subf %54, %46 : vector<8x23xf32>
    %cst_10 = arith.constant 2.000000e+00 : f32
    %56 = vector.broadcast %cst_10 : f32 to vector<8x23xf32>
    %57 = arith.mulf %56, %50 : vector<8x23xf32>
    %cst_11 = arith.constant 2.000000e+00 : f32
    %58 = vector.broadcast %cst_11 : f32 to vector<8x23xf32>
    %59 = arith.mulf %58, %49 : vector<8x23xf32>
    %60 = arith.subf %57, %59 : vector<8x23xf32>
    %cst_12 = arith.constant 2.000000e+00 : f32
    %61 = vector.broadcast %cst_12 : f32 to vector<8x23xf32>
    %62 = arith.mulf %61, %48 : vector<8x23xf32>
    %cst_13 = arith.constant 2.000000e+00 : f32
    %63 = vector.broadcast %cst_13 : f32 to vector<8x23xf32>
    %64 = arith.mulf %63, %51 : vector<8x23xf32>
    %65 = arith.addf %62, %64 : vector<8x23xf32>
    %cst_14 = arith.constant 2.000000e+00 : f32
    %66 = vector.broadcast %cst_14 : f32 to vector<8x23xf32>
    %67 = arith.mulf %66, %49 : vector<8x23xf32>
    %cst_15 = arith.constant 2.000000e+00 : f32
    %68 = vector.broadcast %cst_15 : f32 to vector<8x23xf32>
    %69 = arith.mulf %68, %50 : vector<8x23xf32>
    %70 = arith.addf %67, %69 : vector<8x23xf32>
    %71 = arith.subf %43, %44 : vector<8x23xf32>
    %72 = arith.addf %71, %45 : vector<8x23xf32>
    %73 = arith.subf %72, %46 : vector<8x23xf32>
    %cst_16 = arith.constant 2.000000e+00 : f32
    %74 = vector.broadcast %cst_16 : f32 to vector<8x23xf32>
    %75 = arith.mulf %74, %52 : vector<8x23xf32>
    %cst_17 = arith.constant 2.000000e+00 : f32
    %76 = vector.broadcast %cst_17 : f32 to vector<8x23xf32>
    %77 = arith.mulf %76, %47 : vector<8x23xf32>
    %78 = arith.subf %75, %77 : vector<8x23xf32>
    %cst_18 = arith.constant 2.000000e+00 : f32
    %79 = vector.broadcast %cst_18 : f32 to vector<8x23xf32>
    %80 = arith.mulf %79, %51 : vector<8x23xf32>
    %cst_19 = arith.constant 2.000000e+00 : f32
    %81 = vector.broadcast %cst_19 : f32 to vector<8x23xf32>
    %82 = arith.mulf %81, %48 : vector<8x23xf32>
    %83 = arith.subf %80, %82 : vector<8x23xf32>
    %cst_20 = arith.constant 2.000000e+00 : f32
    %84 = vector.broadcast %cst_20 : f32 to vector<8x23xf32>
    %85 = arith.mulf %84, %47 : vector<8x23xf32>
    %cst_21 = arith.constant 2.000000e+00 : f32
    %86 = vector.broadcast %cst_21 : f32 to vector<8x23xf32>
    %87 = arith.mulf %86, %52 : vector<8x23xf32>
    %88 = arith.addf %85, %87 : vector<8x23xf32>
    %89 = arith.subf %43, %44 : vector<8x23xf32>
    %90 = arith.subf %89, %45 : vector<8x23xf32>
    %91 = arith.addf %90, %46 : vector<8x23xf32>
    %c0_22 = arith.constant 0 : index
    %c0_23 = arith.constant 0 : index
    %92 = vector.load %arg3[%c0_22, %c0_23] : memref<72x128xf32, #tpu.memory_space<vmem>>, vector<9x23xf32>
    %c9 = arith.constant 9 : index
    %c0_24 = arith.constant 0 : index
    %93 = vector.load %arg3[%c9, %c0_24] : memref<72x128xf32, #tpu.memory_space<vmem>>, vector<1x23xf32>
    %c10 = arith.constant 10 : index
    %c0_25 = arith.constant 0 : index
    %94 = vector.load %arg3[%c10, %c0_25] : memref<72x128xf32, #tpu.memory_space<vmem>>, vector<9x23xf32>
    %c19 = arith.constant 19 : index
    %c0_26 = arith.constant 0 : index
    %95 = vector.load %arg3[%c19, %c0_26] : memref<72x128xf32, #tpu.memory_space<vmem>>, vector<1x1xf32>
    %c20 = arith.constant 20 : index
    %c0_27 = arith.constant 0 : index
    %96 = vector.load %arg3[%c20, %c0_27] : memref<72x128xf32, #tpu.memory_space<vmem>>, vector<10x32xf32>
    %c30 = arith.constant 30 : index
    %c0_28 = arith.constant 0 : index
    %97 = vector.load %arg3[%c30, %c0_28] : memref<72x128xf32, #tpu.memory_space<vmem>>, vector<1x32xf32>
    %c31 = arith.constant 31 : index
    %c0_29 = arith.constant 0 : index
    %98 = vector.load %arg3[%c31, %c0_29] : memref<72x128xf32, #tpu.memory_space<vmem>>, vector<1x32xf32>
    %c32 = arith.constant 32 : index
    %c0_30 = arith.constant 0 : index
    %99 = vector.load %arg3[%c32, %c0_30] : memref<72x128xf32, #tpu.memory_space<vmem>>, vector<32x32xf32>
    %c64 = arith.constant 64 : index
    %c0_31 = arith.constant 0 : index
    %100 = vector.load %arg3[%c64, %c0_31] : memref<72x128xf32, #tpu.memory_space<vmem>>, vector<1x32xf32>
    %c65 = arith.constant 65 : index
    %c0_32 = arith.constant 0 : index
    %101 = vector.load %arg3[%c65, %c0_32] : memref<72x128xf32, #tpu.memory_space<vmem>>, vector<1x1xf32>
    %102 = vector.extract_strided_slice %92 {offsets = [0, 0], sizes = [1, 23], strides = [1, 1]} : vector<9x23xf32> to vector<1x23xf32>
    %103 = vector.broadcast %102 : vector<1x23xf32> to vector<8x23xf32>
    %104 = arith.mulf %55, %103 : vector<8x23xf32>
    %105 = vector.broadcast %93 : vector<1x23xf32> to vector<8x23xf32>
    %106 = arith.addf %105, %104 : vector<8x23xf32>
    %107 = vector.extract_strided_slice %94 {offsets = [0, 0], sizes = [1, 23], strides = [1, 1]} : vector<9x23xf32> to vector<1x23xf32>
    %108 = vector.broadcast %107 : vector<1x23xf32> to vector<8x23xf32>
    %109 = arith.mulf %55, %108 : vector<8x23xf32>
    %110 = vector.extract_strided_slice %92 {offsets = [1, 0], sizes = [1, 23], strides = [1, 1]} : vector<9x23xf32> to vector<1x23xf32>
    %111 = vector.broadcast %110 : vector<1x23xf32> to vector<8x23xf32>
    %112 = arith.mulf %60, %111 : vector<8x23xf32>
    %113 = arith.addf %106, %112 : vector<8x23xf32>
    %114 = vector.extract_strided_slice %94 {offsets = [1, 0], sizes = [1, 23], strides = [1, 1]} : vector<9x23xf32> to vector<1x23xf32>
    %115 = vector.broadcast %114 : vector<1x23xf32> to vector<8x23xf32>
    %116 = arith.mulf %60, %115 : vector<8x23xf32>
    %117 = arith.addf %109, %116 : vector<8x23xf32>
    %118 = vector.extract_strided_slice %92 {offsets = [2, 0], sizes = [1, 23], strides = [1, 1]} : vector<9x23xf32> to vector<1x23xf32>
    %119 = vector.broadcast %118 : vector<1x23xf32> to vector<8x23xf32>
    %120 = arith.mulf %65, %119 : vector<8x23xf32>
    %121 = arith.addf %113, %120 : vector<8x23xf32>
    %122 = vector.extract_strided_slice %94 {offsets = [2, 0], sizes = [1, 23], strides = [1, 1]} : vector<9x23xf32> to vector<1x23xf32>
    %123 = vector.broadcast %122 : vector<1x23xf32> to vector<8x23xf32>
    %124 = arith.mulf %65, %123 : vector<8x23xf32>
    %125 = arith.addf %117, %124 : vector<8x23xf32>
    %126 = vector.extract_strided_slice %92 {offsets = [3, 0], sizes = [1, 23], strides = [1, 1]} : vector<9x23xf32> to vector<1x23xf32>
    %127 = vector.broadcast %126 : vector<1x23xf32> to vector<8x23xf32>
    %128 = arith.mulf %70, %127 : vector<8x23xf32>
    %129 = arith.addf %121, %128 : vector<8x23xf32>
    %130 = vector.extract_strided_slice %94 {offsets = [3, 0], sizes = [1, 23], strides = [1, 1]} : vector<9x23xf32> to vector<1x23xf32>
    %131 = vector.broadcast %130 : vector<1x23xf32> to vector<8x23xf32>
    %132 = arith.mulf %70, %131 : vector<8x23xf32>
    %133 = arith.addf %125, %132 : vector<8x23xf32>
    %134 = vector.extract_strided_slice %92 {offsets = [4, 0], sizes = [1, 23], strides = [1, 1]} : vector<9x23xf32> to vector<1x23xf32>
    %135 = vector.broadcast %134 : vector<1x23xf32> to vector<8x23xf32>
    %136 = arith.mulf %73, %135 : vector<8x23xf32>
    %137 = arith.addf %129, %136 : vector<8x23xf32>
    %138 = vector.extract_strided_slice %94 {offsets = [4, 0], sizes = [1, 23], strides = [1, 1]} : vector<9x23xf32> to vector<1x23xf32>
    %139 = vector.broadcast %138 : vector<1x23xf32> to vector<8x23xf32>
    %140 = arith.mulf %73, %139 : vector<8x23xf32>
    %141 = arith.addf %133, %140 : vector<8x23xf32>
    %142 = vector.extract_strided_slice %92 {offsets = [5, 0], sizes = [1, 23], strides = [1, 1]} : vector<9x23xf32> to vector<1x23xf32>
    %143 = vector.broadcast %142 : vector<1x23xf32> to vector<8x23xf32>
    %144 = arith.mulf %78, %143 : vector<8x23xf32>
    %145 = arith.addf %137, %144 : vector<8x23xf32>
    %146 = vector.extract_strided_slice %94 {offsets = [5, 0], sizes = [1, 23], strides = [1, 1]} : vector<9x23xf32> to vector<1x23xf32>
    %147 = vector.broadcast %146 : vector<1x23xf32> to vector<8x23xf32>
    %148 = arith.mulf %78, %147 : vector<8x23xf32>
    %149 = arith.addf %141, %148 : vector<8x23xf32>
    %150 = vector.extract_strided_slice %92 {offsets = [6, 0], sizes = [1, 23], strides = [1, 1]} : vector<9x23xf32> to vector<1x23xf32>
    %151 = vector.broadcast %150 : vector<1x23xf32> to vector<8x23xf32>
    %152 = arith.mulf %83, %151 : vector<8x23xf32>
    %153 = arith.addf %145, %152 : vector<8x23xf32>
    %154 = vector.extract_strided_slice %94 {offsets = [6, 0], sizes = [1, 23], strides = [1, 1]} : vector<9x23xf32> to vector<1x23xf32>
    %155 = vector.broadcast %154 : vector<1x23xf32> to vector<8x23xf32>
    %156 = arith.mulf %83, %155 : vector<8x23xf32>
    %157 = arith.addf %149, %156 : vector<8x23xf32>
    %158 = vector.extract_strided_slice %92 {offsets = [7, 0], sizes = [1, 23], strides = [1, 1]} : vector<9x23xf32> to vector<1x23xf32>
    %159 = vector.broadcast %158 : vector<1x23xf32> to vector<8x23xf32>
    %160 = arith.mulf %88, %159 : vector<8x23xf32>
    %161 = arith.addf %153, %160 : vector<8x23xf32>
    %162 = vector.extract_strided_slice %94 {offsets = [7, 0], sizes = [1, 23], strides = [1, 1]} : vector<9x23xf32> to vector<1x23xf32>
    %163 = vector.broadcast %162 : vector<1x23xf32> to vector<8x23xf32>
    %164 = arith.mulf %88, %163 : vector<8x23xf32>
    %165 = arith.addf %157, %164 : vector<8x23xf32>
    %166 = vector.extract_strided_slice %92 {offsets = [8, 0], sizes = [1, 23], strides = [1, 1]} : vector<9x23xf32> to vector<1x23xf32>
    %167 = vector.broadcast %166 : vector<1x23xf32> to vector<8x23xf32>
    %168 = arith.mulf %91, %167 : vector<8x23xf32>
    %169 = arith.addf %161, %168 : vector<8x23xf32>
    %170 = vector.extract_strided_slice %94 {offsets = [8, 0], sizes = [1, 23], strides = [1, 1]} : vector<9x23xf32> to vector<1x23xf32>
    %171 = vector.broadcast %170 : vector<1x23xf32> to vector<8x23xf32>
    %172 = arith.mulf %91, %171 : vector<8x23xf32>
    %173 = arith.addf %165, %172 : vector<8x23xf32>
    %cst_33 = arith.constant dense<0.000000e+00> : vector<8xf32>
    %174 = vector.multi_reduction <add>, %173, %cst_33 [1] : vector<8x23xf32> to vector<8xf32>
    %175 = vector.shape_cast %174 : vector<8xf32> to vector<8x1xf32>
    %176 = vector.broadcast %95 : vector<1x1xf32> to vector<8x1xf32>
    %177 = arith.addf %175, %176 : vector<8x1xf32>
    %cst_34 = arith.constant 0.000000e+00 : f32
    %178 = vector.broadcast %cst_34 : f32 to vector<8x23xf32>
    %179 = arith.subf %178, %169 : vector<8x23xf32>
    %180 = math.exp %179 : vector<8x23xf32>
    %cst_35 = arith.constant 1.000000e+00 : f32
    %181 = vector.broadcast %cst_35 : f32 to vector<8x23xf32>
    %182 = arith.addf %181, %180 : vector<8x23xf32>
    %cst_36 = arith.constant 1.000000e+00 : f32
    %183 = vector.broadcast %cst_36 : f32 to vector<8x23xf32>
    %184 = arith.divf %183, %182 : vector<8x23xf32>
    %cst_37 = arith.constant 0.000000e+00 : f32
    %185 = vector.broadcast %cst_37 : f32 to vector<8x1xf32>
    %186 = arith.subf %185, %177 : vector<8x1xf32>
    %187 = math.exp %186 : vector<8x1xf32>
    %cst_38 = arith.constant 1.000000e+00 : f32
    %188 = vector.broadcast %cst_38 : f32 to vector<8x1xf32>
    %189 = arith.addf %188, %187 : vector<8x1xf32>
    %cst_39 = arith.constant 1.000000e+00 : f32
    %190 = vector.broadcast %cst_39 : f32 to vector<8x1xf32>
    %191 = arith.divf %190, %189 : vector<8x1xf32>
    %c0_40 = arith.constant 0 : index
    %c0_41 = arith.constant 0 : index
    %192 = vector.load %arg2[%c0_40, %c0_41] : memref<8x10xf32, #tpu.memory_space<vmem>>, vector<8x10xf32>
    %cst_42 = arith.constant dense<0.000000e+00> : vector<8x32xf32>
    %193 = tpu.matmul %192, %96, %cst_42 {dimension_numbers = #tpu.dot_dimension_numbers<[1], [0], [0], [1], [0, 0, 1, 1], [], []>} : vector<8x10xf32>, vector<10x32xf32>, vector<8x32xf32> -> vector<8x32xf32>
    %194 = vector.broadcast %97 : vector<1x32xf32> to vector<8x32xf32>
    %195 = arith.addf %193, %194 : vector<8x32xf32>
    %cst_43 = arith.constant 0.000000e+00 : f32
    %196 = vector.broadcast %cst_43 : f32 to vector<8x32xf32>
    %197 = arith.maximumf %195, %196 : vector<8x32xf32>
    %cst_44 = arith.constant dense<0.000000e+00> : vector<8x32xf32>
    %198 = tpu.matmul %197, %99, %cst_44 {dimension_numbers = #tpu.dot_dimension_numbers<[1], [0], [0], [1], [0, 0, 1, 1], [], []>} : vector<8x32xf32>, vector<32x32xf32>, vector<8x32xf32> -> vector<8x32xf32>
    %199 = vector.broadcast %98 : vector<1x32xf32> to vector<8x32xf32>
    %200 = arith.addf %198, %199 : vector<8x32xf32>
    %cst_45 = arith.constant 0.000000e+00 : f32
    %201 = vector.broadcast %cst_45 : f32 to vector<8x32xf32>
    %202 = arith.maximumf %200, %201 : vector<8x32xf32>
    %203 = vector.broadcast %100 : vector<1x32xf32> to vector<8x32xf32>
    %204 = arith.mulf %202, %203 : vector<8x32xf32>
    %cst_46 = arith.constant dense<0.000000e+00> : vector<8xf32>
    %205 = vector.multi_reduction <add>, %204, %cst_46 [1] : vector<8x32xf32> to vector<8xf32>
    %206 = vector.shape_cast %205 : vector<8xf32> to vector<8x1xf32>
    %207 = vector.broadcast %101 : vector<1x1xf32> to vector<8x1xf32>
    %208 = arith.addf %206, %207 : vector<8x1xf32>
    %cst_47 = arith.constant 0.000000e+00 : f32
    %209 = vector.broadcast %cst_47 : f32 to vector<8x1xf32>
    %210 = arith.subf %209, %208 : vector<8x1xf32>
    %211 = math.exp %210 : vector<8x1xf32>
    %cst_48 = arith.constant 1.000000e+00 : f32
    %212 = vector.broadcast %cst_48 : f32 to vector<8x1xf32>
    %213 = arith.addf %212, %211 : vector<8x1xf32>
    %cst_49 = arith.constant 1.000000e+00 : f32
    %214 = vector.broadcast %cst_49 : f32 to vector<8x1xf32>
    %215 = arith.divf %214, %213 : vector<8x1xf32>
    %cst_50 = arith.constant 0.000000e+00 : f32
    %216 = vector.broadcast %cst_50 : f32 to vector<8x7xf32>
    %217 = tpu.concatenate %184, %191, %215, %216 in 1 : vector<8x23xf32>, vector<8x1xf32>, vector<8x1xf32>, vector<8x7xf32> -> vector<8x32xf32>
    %c0_51 = arith.constant 0 : index
    %c0_52 = arith.constant 0 : index
    %218 = vector.load %arg4[%c0_51, %c0_52] : memref<8x32xf32, #tpu.memory_space<vmem>>, vector<8x32xf32>
    tpu.vector_store %arg4[%c0_51, %c0_52], %217 {strides = array<i32>} : memref<8x32xf32, #tpu.memory_space<vmem>>, vector<8x32xf32>,
    return
  }
  func.func @transform_0(%arg0: i32) -> (i32, i32, i32) {
    %c0_i32 = arith.constant 0 : i32
    %c0_i32_0 = arith.constant 0 : i32
    %c0_i32_1 = arith.constant 0 : i32
    return %c0_i32, %arg0, %c0_i32_0 : i32, i32, i32
  }
  func.func @transform_1(%arg0: i32) -> (i32, i32) {
    %c0_i32 = arith.constant 0 : i32
    %c0_i32_0 = arith.constant 0 : i32
    return %arg0, %c0_i32 : i32, i32
  }
  func.func @transform_2(%arg0: i32) -> (i32, i32) {
    %c0_i32 = arith.constant 0 : i32
    %c0_i32_0 = arith.constant 0 : i32
    %c0_i32_1 = arith.constant 0 : i32
    return %c0_i32, %c0_i32_0 : i32, i32
  }
  func.func @transform_3(%arg0: i32) -> (i32, i32) {
    %c0_i32 = arith.constant 0 : i32
    %c0_i32_0 = arith.constant 0 : i32
    return %arg0, %c0_i32 : i32, i32
  }
}

</mosaic_0001>

<bundles_post_ra>
// kernel: discriminator_forward.1
= control target key start
LH: loop header
LB: loop body
LE: loop exit
PB: predicated region body
PF: predicated region fallthrough
CT: control target
= control target key end

     0   :  { %vm449_vm0 = vcmask 1041408   ;;  %v735_v0 = vmov 0.0|0.0   ;;  %vm736_vm1 = vmmov 1   ;;  %vm737_vm3 = vmmov 0   ;;  %s745_s21 = smov 23   ;;  %s746_s24 = smov 24   ;;  %s901_s2 = inlined_call_operand.vmem [shape: f32[72,128], index: 2, kind: input, shape index: {}]   ;;  %s902_s1 = inlined_call_operand.vmem [shape: f32[8,10], index: 1, kind: input, shape index: {}]   ;;  %s903_s0 = inlined_call_operand.vmem [shape: f32[3,8,23], index: 0, kind: input, shape index: {}]   ;;  %s904_s3 = inlined_call_operand.vmem [shape: f32[8,32], index: 3, kind: output, shape index: {}]  }
   0x1   :  { %687 = vmatprep.subr.bf16.mxu0 %v735_v0  ;;  %v298_v1 = vld [vmem:[%s901_s2 + $0x14] sm:$0xff]  ;;  %v299_v2 = vld [vmem:[%s901_s2 + $0x1c] sm:$0x3]  ;;  %vm689_vm2 = vmpackc.low %vm449_vm0, %vm736_vm1  ;;  %691 = vmatprep.subr.bf16.mxu1 %v735_v0  ;;  %v738_v4 = vmov 0.0   ;;  %vm445_vm4 = vcmask 80896   ;;  %vm528_vm13 = vcmask 261120  }
   0x2   :  { %v688_v3 = vpack.c.bf16 %v299_v2, %v298_v1  ;;  %673 = vmatprep.mubr.msk.f32.mxu0 %vm737_vm3, %v738_v4  ;;  %v302_v5 = vld [vmem:[%s901_s2 + $0x20] sm:$0xff]  ;;  %v303_v6 = vld [vmem:[%s901_s2 + $0x28] sm:$0xff]  ;;  %684 = vmatprep.mubr.msk.f32.mxu1 %vm737_vm3, %v738_v4  ;;  %v304_v9 = vld [vmem:[%s901_s2 + $0x30] sm:$0xff]  ;;  %v739_v37 = vmov 2102212464  }
   0x3   :  { %v692_v7 = vpack.c.bf16 %v303_v6, %v302_v5  ;;  %v440_v8 = vld [vmem:[%s902_s1] sm:$0xff]  ;;  %v305_v10 = vld [vmem:[%s901_s2 + $0x38] sm:$0xff]  ;;  %v796_v13 = vld [vmem:[%s903_s0 + $0x8] sm:$0xff]  ;;  %v740_v41 = vmov 683565275  }
   0x4   :  { %690 = vmatpush3.bf16.msk.msra.mxu0 %vm689_vm2, %v688_v3  ;;  %v695_v11 = vpack.c.bf16 %v305_v10, %v304_v9  ;;  %v791_v12 = vld [vmem:[%s903_s0] sm:$0xff]  ;;  %v20_v15 = vadd.f32 1e-08, %v796_v13  ;;  %v803_v16 = vld [vmem:[%s903_s0 + $0x10] sm:$0xff]  ;;  %v741_v43 = vmov 2475754826  }
   0x5   :  { %693 = vmatpush3.bf16.msra.mxu1 %v692_v7  ;;  %v19_v14 = vadd.f32 1e-08, %v791_v12  ;;  %v21_v17 = vadd.f32 1e-08, %v803_v16  ;;  %v742_v46 = vmov 2131351028  }
   0x6   :  { %694 = vmatprep.subr.bf16.mxu1 %v735_v0  ;;  %v23_v19 = vmul.f32 %v20_v15, %v20_v15  ;;  %v743_v52 = vmov 920167782   ;;  %v744_v58 = vmov 1326507024  }
   0x7   :  { %674 = vmatmul.mubr.msk.f32.vlgmr.msra.gmra.mrb[0].mxu0 %vm445_vm4, %v440_v8  ;;  %v22_v18 = vmul.f32 %v19_v14, %v19_v14  ;;  %v25_v21 = vmul.f32 %v21_v17, %v21_v17 }
   0x9   :  { %696 = vmatpush3.bf16.msra.mxu1 %v695_v11  ;;  %v24_v20 = vadd.f32 %v23_v19, %v22_v18 }
   0xb   :  { %v806_v22 = vadd.f32 %v25_v21, %v24_v20 }
   0xd   :  { %713 = vrsqrt.f32 %v806_v22  ;;  %vm29_vm5 = vcmp.eq.f32.partialorder %v806_v22, inf  ;;  %v32_v25 = vand.u32 2147483648, %v806_v22  ;;  %vm31_vm6 = vcmp.eq.f32.partialorder %v806_v22, 0.0 }
  0x17   :  { %v714_v23 = vpop.eup %713 }
  0x18   :  { %v28_v24 = vmul.f32 %v714_v23, %v806_v22 }
  0x1a   :  { %v30_v26 = vsel %vm29_vm5, %v806_v22, %v28_v24  ;;  %v654_v24 = vld [vmem:[%s901_s2 + $0x1e] ss:$0 sm:$0xff] }
  0x1b   :  { %v33_v27 = vsel %vm31_vm6, %v32_v25, %v30_v26 }
  0x1c   :  { %v814_v28 = vmul.f32 0.5, %v33_v27 }
  0x1e   :  { %v43_v29 = vand.u32 2139095040, %v814_v28  ;;  %v40_v36 = vand.u32 2147483647, %v814_v28  ;;  %vm42_vm15 = vcmp.lt.s32.totalorder %v814_v28, 0 }
  0x20   :  { %v44_v30 = vshrl.u32 %v43_v29, 23  ;;  %v47_v39 = vand.u32 8388607, %v40_v36  ;;  %vm41_vm0 = vcmp.le.f32.partialorder %v40_v36, 0.7853982 }
  0x22   :  { %v642_v31 = vadd.s32 4294967169, %v44_v30  ;;  %v48_v50 = vor.u32 8388608, %v47_v39 }
  0x24   :  { %v50_v32 = vadd.s32 1, %v642_v31  ;;  %v88_v63 = vshll.u32 %v48_v50, 8 }
  0x26   :  { %vm51_vm7 = vcmp.gt.s32.totalorder %v50_v32, 0 }
  0x27   :  { %v52_v33 = vsel %vm51_vm7, %v50_v32, 0  ;;  %vm132_vm7 = vweird.f32 %v814_v28 }
  0x28   :  { %v54_v34 = vand.u32 31, %v52_v33  ;;  %v53_v40 = vshrl.u32 %v52_v33, 5 }
  0x2a   :  { %v55_v35 = vsub.s32 32, %v54_v34  ;;  %v66_v38 = vshll.u32 %v739_v37, %v54_v34  ;;  %v57_v42 = vshll.u32 %v740_v41, %v54_v34  ;;  %v60_v45 = vshll.u32 %v741_v43, %v54_v34 }
  0x2b   :  { %v63_v48 = vshll.u32 %v742_v46, %v54_v34  ;;  %v69_v54 = vshll.u32 %v743_v52, %v54_v34  ;;  %vm72_vm8 = vcmp.lt.s32.totalorder %v53_v40, 1  ;;  %vm74_vm9 = vcmp.lt.s32.totalorder %v53_v40, 3 }
  0x2c   :  { %v58_v44 = vshrl.u32 %v741_v43, %v55_v35  ;;  %v61_v47 = vshrl.u32 %v742_v46, %v55_v35  ;;  %v64_v49 = vshrl.u32 %v739_v37, %v55_v35  ;;  %v67_v53 = vshrl.u32 %v743_v52, %v55_v35 }
  0x2d   :  { %v70_v59 = vshrl.u32 %v744_v58, %v55_v35  ;;  %vm73_vm10 = vcmp.lt.s32.totalorder %v53_v40, 2  ;;  %vm75_vm11 = vcmp.lt.s32.totalorder %v53_v40, 4  ;;  %v56_v0 = vshrl.u32 %v740_v41, %v55_v35 }
  0x2e   :  { %v59_v51 = vor.u32 %v58_v44, %v57_v42  ;;  %v62_v55 = vor.u32 %v61_v47, %v60_v45  ;;  %v65_v56 = vor.u32 %v64_v49, %v63_v48  ;;  %v68_v57 = vor.u32 %v67_v53, %v66_v38 }
  0x2f   :  { %v71_v61 = vor.u32 %v70_v59, %v69_v54  ;;  %v34_v52 = vmax.f32 %v806_v22, 1e-24 }
  0x30   :  { %v80_v60 = vsel %vm72_vm8, %v59_v51, %v62_v55  ;;  %v81_v62 = vsel %vm75_vm11, %v68_v57, 920167782  ;;  %v84_v2 = vsel %vm72_vm8, %v62_v55, %v65_v56  ;;  %v77_v3 = vsel %vm75_vm11, %v65_v56, 2102212464 }
  0x31   :  { %v82_v1 = vsel %vm74_vm9, %v65_v56, %v81_v62  ;;  %v85_v5 = vsel %vm75_vm11, %v71_v61, 1326507024  ;;  %v76_v6 = vsel %vm72_vm8, %v56_v0, %v59_v51  ;;  %v78_v7 = vsel %vm74_vm9, %v62_v55, %v77_v3 }
  0x32   :  { %v83_v4 = vsel %vm73_vm10, %v80_v60, %v82_v1  ;;  %v86_v8 = vsel %vm74_vm9, %v68_v57, %v85_v5  ;;  %v79_v9 = vsel %vm73_vm10, %v76_v6, %v78_v7  ;;  %715 = vrsqrt.f32 %v34_v52 }
  0x33   :  { %v87_v10 = vsel %vm73_vm10, %v84_v2, %v86_v8  ;;  %v826_v11 = vmul.u32.u64.low %v88_v63, %v83_v4  ;;  %v827_v14 = vmul.u32.u64.high %v88_v63, %v83_v4, %v826_v11  ;;  %v95_v18 = vmul.u32 %v88_v63, %v79_v9 }
  0x34   :  { %v829_v15 = vmul.u32.u64.low %v88_v63, %v87_v10  ;;  %v830_v17 = vmul.u32.u64.high %v88_v63, %v87_v10, %v829_v15  ;;  %vm419_vm8 = vcmask 187392   ;;  %vm631_vm9 = vcmask 195584  }
  0x35   :  { %v98_v19 = vadd.s32 1, %v827_v14  ;;  %vm633_vm10 = vcmask 203776  }
  0x36   :  { %vm97_vm12 = vc.u32 %v830_v17, %v826_v11  ;;  %v96_v38 = vadd.s32 %v826_v11, %v830_v17 }
  0x37   :  { %v99_v20 = vsel %vm97_vm12, %v98_v19, %v827_v14 }
  0x38   :  { %v100_v21 = vadd.s32 %v99_v20, %v95_v18 }
  0x3a   :  { %v101_v23 = vadd.s32 536870912, %v100_v21 }
  0x3c   :  { %v102_v25 = vshrl.u32 %v101_v23, 30  ;;  %v716_v61 = vpop.eup %715 }
  0x3d   :  { %v36_v22 = vmul.f32 %v716_v61, %v791_v12  ;;  %v37_v1 = vmul.f32 %v716_v61, %v796_v13  ;;  %v38_v4 = vmul.f32 %v716_v61, %v803_v16 }
  0x3e   :  { %v103_v27 = vshll.u32 %v102_v25, 30  ;;  %v126_v55 = vsub.s32 4, %v102_v25 }
  0x40   :  { %v104_v31 = vsub.s32 %v100_v21, %v103_v27  ;;  %v127_v56 = vsel %vm42_vm15, %v126_v55, %v102_v25  ;;  %v308_v21 = vlaneseq }
  0x41   :  { %v129_v57 = vsel %vm41_vm0, 0, %v127_v56 }
  0x42   :  { %v106_v33 = vsub.s32 0, %v104_v31  ;;  %v236_v58 = vadd.s32 3, %v129_v57  ;;  %v133_v60 = vand.u32 3, %v129_v57  ;;  %v849_v16 = vshrl.u32 %v308_v21, 7 }
  0x44   :  { %v643_v34 = vmin.u32 %v106_v33, %v104_v31  ;;  %v237_v59 = vand.u32 3, %v236_v58  ;;  %vm138_vm1 = vcmp.eq.s32.totalorder %v133_v60, 2  ;;  %vm135_vm3 = vcmp.eq.s32.totalorder %v133_v60, 0 }
  0x45   :  { %vm134_vm5 = vcmp.lt.s32.totalorder %v133_v60, 2  ;;  %v349_v52 = vsub.s32 3, %v849_v16 }
  0x46   :  { %v108_v35 = vclz %v643_v34  ;;  %vm242_vm2 = vcmp.eq.s32.totalorder %v237_v59, 2  ;;  %vm239_vm4 = vcmp.eq.s32.totalorder %v237_v59, 0  ;;  %vm238_vm6 = vcmp.lt.s32.totalorder %v237_v59, 2 }
  0x48   :  { %v644_v37 = vadd.s32 4294967294, %v108_v35  ;;  %v295_v35 = vld [vmem:[%s901_s2 + $0xa] sm:$0xff] }
  0x49   :  { %v356_v60 = vrot.slane %v295_v35, %v349_v52 }
  0x4a   :  { %vm645_vm14 = vcmp.lt.s32.totalorder %v644_v37, 0 }
  0x4b   :  { %v111_v39 = vsel %vm645_vm14, 0, %v644_v37 }
  0x4c   :  { %v112_v40 = vsub.s32 32, %v111_v39  ;;  %v113_v41 = vshll.u32 %v104_v31, %v111_v39  ;;  %v116_v42 = vsub.s32 4294967266, %v111_v39 }
  0x4e   :  { %v114_v43 = vshrl.u32 %v96_v38, %v112_v40  ;;  %v117_v44 = vadd.s32 127, %v116_v42 }
  0x50   :  { %v115_v45 = vor.u32 %v114_v43, %v113_v41  ;;  %v118_v46 = vshll.u32 %v117_v44, 23  ;;  %v337_v44 = vsub.s32 2, %v849_v16 }
  0x52   :  { %v119_v47 = vor.u32 4788187, %v118_v46  ;;  %v122_v48 = vcvt.s32.f32 %v115_v45 }
  0x54   :  { %v120_v49 = vand.u32 2147483647, %v119_v47 }
  0x56   :  { %v123_v50 = vmul.f32 %v122_v48, %v120_v49 }
  0x58   :  { %v124_v51 = vxor.u32 2147483648, %v123_v50 }
  0x5a   :  { %v125_v53 = vsel %vm42_vm15, %v124_v51, %v123_v50  ;;  %v344_v51 = vrot.slane %v295_v35, %v337_v44 }
  0x5b   :  { %v128_v54 = vsel %vm41_vm0, %v814_v28, %v125_v53 }
  0x5c   :  { %717 = vcosq.f32 %v128_v54 }
  0x5d   :  { %719 = vsinq.f32 %v128_v54 }
  0x66   :  { %v718_v62 = vpop.eup %717 }
  0x67   :  { %v720_v36 = vpop.eup %719  ;;  %v139_v63 = vxor.u32 2147483648, %v718_v62 }
  0x68   :  { %v136_v0 = vxor.u32 2147483648, %v720_v36 }
  0x69   :  { %v140_v2 = vsel %vm138_vm1, %v139_v63, %v720_v36  ;;  %v244_v3 = vsel %vm242_vm2, %v139_v63, %v720_v36 }
  0x6a   :  { %v137_v5 = vsel %vm135_vm3, %v718_v62, %v136_v0  ;;  %v241_v6 = vsel %vm239_vm4, %v718_v62, %v136_v0 }
  0x6b   :  { %v141_v7 = vsel %vm134_vm5, %v137_v5, %v140_v2  ;;  %v245_v8 = vsel %vm238_vm6, %v241_v6, %v244_v3  ;;  %v373_v2 = vsub.s32 5, %v849_v16  ;;  %v385_v3 = vsub.s32 6, %v849_v16 }
  0x6c   :  { %v142_v9 = vsel %vm132_vm7, nan, %v141_v7  ;;  %v246_v10 = vsel %vm132_vm7, nan, %v245_v8 }
  0x6d   :  { %v247_v11 = vmul.f32 %v246_v10, %v36_v22  ;;  %v248_v14 = vmul.f32 %v246_v10, %v37_v1  ;;  %v249_v12 = vmul.f32 %v246_v10, %v38_v4  ;;  %v250_v15 = vmul.f32 %v142_v9, %v142_v9 }
  0x6e   :  { %v361_v1 = vsub.s32 4, %v849_v16 }
  0x6f   :  { %v251_v17 = vmul.f32 %v247_v11, %v247_v11  ;;  %v253_v18 = vmul.f32 %v248_v14, %v248_v14  ;;  %v255_v13 = vmul.f32 %v249_v12, %v249_v12 }
  0x70   :  { %v368_v7 = vrot.slane %v295_v35, %v361_v1 }
  0x71   :  { %v252_v19 = vadd.f32 %v251_v17, %v250_v15 }
  0x73   :  { %v254_v20 = vadd.f32 %v253_v18, %v252_v19 }
  0x75   :  { %v256_v28 = vadd.f32 %v255_v13, %v254_v20 }
  0x77   :  { %721 = vrsqrt.f32 %v256_v28 }
  0x81   :  { %v722_v23 = vpop.eup %721 }
  0x82   :  { %v259_v25 = vmul.f32 %v722_v23, %v247_v11  ;;  %v261_v27 = vmul.f32 %v722_v23, %v249_v12  ;;  %v397_v12 = vsub.s32 7, %v849_v16 }
  0x84   :  { %v265_v34 = vmul.f32 %v261_v27, %v261_v27  ;;  %v270_v40 = vmul.f32 %v261_v27, %v259_v25  ;;  %v404_v28 = vrot.slane %v295_v35, %v397_v12 }
  0x86   :  { %v279_v48 = vmul.f32 2.0, %v270_v40 }
  0xda   :  { %v519_v26 = vpop.f32.mrb[0].mxu0 }
  0xdb   :  { %v520_v29 = vadd.f32 %v654_v24, %v519_v26  ;;  %v675_v30 = vpop.f32.mrb[1].mxu0  ;;  %v258_v24 = vmul.f32 %v722_v23, %v142_v9  ;;  %v260_v26 = vmul.f32 %v722_v23, %v248_v14  ;;  %v380_v9 = vrot.slane %v295_v35, %v373_v2  ;;  %v652_v23 = vld [vmem:[%s901_s2 + $0x12] ss:$0 sm:$0xff] }
  0xdc   :  { %v325_v30 = vsub.s32 1, %v849_v16  ;;  %v392_v14 = vrot.slane %v295_v35, %v385_v3 }
  0xdd   :  { %v523_v32 = vmax.f32 %v520_v29, 0.0  ;;  %v310_v29 = vsub.s32 0, %v849_v16  ;;  %v262_v31 = vmul.f32 %v258_v24, %v258_v24  ;;  %v264_v33 = vmul.f32 %v260_v26, %v260_v26 }
  0xde   :  { %v267_v37 = vmul.f32 %v260_v26, %v258_v24  ;;  %v268_v38 = vmul.f32 %v261_v27, %v258_v24  ;;  %v269_v39 = vmul.f32 %v260_v26, %v259_v25  ;;  %v332_v43 = vrot.slane %v295_v35, %v325_v30 }
  0xdf   :  { %685 = vmatmul.mubr.msk.f32.vlgmr.msra.gmra.mrb[0].mxu1 %vm528_vm13, %v523_v32  ;;  %v263_v32 = vmul.f32 %v259_v25, %v259_v25  ;;  %v321_v42 = vrot.slane %v295_v35, %v310_v29  ;;  %v266_v53 = vmul.f32 %v259_v25, %v258_v24  ;;  %v271_v54 = vmul.f32 %v261_v27, %v260_v26  ;;  %v292_v27 = vld [vmem:[%s901_s2] sm:$0xff] }
  0xe0   :  { %v275_v45 = vmul.f32 2.0, %v269_v39  ;;  %v276_v46 = vmul.f32 2.0, %v268_v38  ;;  %v278_v47 = vmul.f32 2.0, %v267_v37  ;;  %v350_v35 = vrot.slane %v292_v27, %v349_v52 }
  0xe1   :  { %v272_v41 = vadd.f32 %v263_v32, %v262_v31  ;;  %v282_v50 = vsub.f32 %v262_v31, %v263_v32  ;;  %v285_v61 = vmul.f32 2.0, %v271_v54  ;;  %v286_v62 = vmul.f32 2.0, %v266_v53 }
  0xe2   :  { %v277_v55 = vsub.f32 %v275_v45, %v276_v46  ;;  %v280_v56 = vadd.f32 %v279_v48, %v278_v47  ;;  %v281_v58 = vadd.f32 %v276_v46, %v275_v45  ;;  %v288_v8 = vsub.f32 %v279_v48, %v278_v47  ;;  %v650_v46 = vld [vmem:[%s901_s2 + $0x9] ss:$0 sm:$0xff] }
  0xe3   :  { %v273_v49 = vsub.f32 %v272_v41, %v264_v33  ;;  %v283_v59 = vadd.f32 %v282_v50, %v264_v33  ;;  %v287_v4 = vsub.f32 %v285_v61, %v286_v62  ;;  %v290_v15 = vsub.f32 %v282_v50, %v264_v33 }
  0xe4   :  { %v333_v36 = vmul.f32 %v332_v43, %v277_v55  ;;  %v345_v0 = vmul.f32 %v344_v51, %v280_v56  ;;  %v357_v6 = vmul.f32 %v356_v60, %v281_v58  ;;  %v289_v19 = vadd.f32 %v286_v62, %v285_v61 }
  0xe5   :  { %v274_v57 = vsub.f32 %v273_v49, %v265_v34  ;;  %v284_v63 = vsub.f32 %v283_v59, %v265_v34  ;;  %v381_v18 = vmul.f32 %v380_v9, %v287_v4  ;;  %v393_v20 = vmul.f32 %v392_v14, %v288_v8 }
  0xe6   :  { %v291_v21 = vadd.f32 %v290_v15, %v265_v34  ;;  %v405_v26 = vmul.f32 %v404_v28, %v289_v19  ;;  %v311_v32 = vrot.slane %v292_v27, %v310_v29  ;;  %v326_v33 = vrot.slane %v292_v27, %v325_v30 }
  0xe7   :  { %v322_v22 = vmul.f32 %v321_v42, %v274_v57  ;;  %v369_v11 = vmul.f32 %v368_v7, %v284_v63  ;;  %v338_v34 = vrot.slane %v292_v27, %v337_v44  ;;  %v362_v37 = vrot.slane %v292_v27, %v361_v1 }
  0xe8   :  { %v417_v31 = vmul.f32 %v652_v23, %v291_v21  ;;  %v374_v38 = vrot.slane %v292_v27, %v373_v2  ;;  %v386_v39 = vrot.slane %v292_v27, %v385_v3  ;;  %v398_v40 = vrot.slane %v292_v27, %v397_v12  ;;  %v653_v3 = vld [vmem:[%s901_s2 + $0x13] ss:$0 sm:$0xff] }
  0xe9   :  { %v334_v5 = vadd.f32 %v333_v36, %v322_v22  ;;  %v327_v41 = vmul.f32 %v326_v33, %v277_v55  ;;  %v339_v42 = vmul.f32 %v338_v34, %v280_v56  ;;  %v351_v43 = vmul.f32 %v350_v35, %v281_v58  ;;  %v651_v55 = vld [vmem:[%s901_s2 + $0x8] ss:$0 sm:$0xff]  ;;  %v659_v22 = vld [vmem:[%s901_s2 + $0x40] ss:$0 sm:$0xff] }
  0xea   :  { %v363_v47 = vmul.f32 %v362_v37, %v284_v63  ;;  %v375_v48 = vmul.f32 %v374_v38, %v287_v4  ;;  %v387_v29 = vmul.f32 %v386_v39, %v288_v8  ;;  %v399_v49 = vmul.f32 %v398_v40, %v289_v19 }
  0xeb   :  { %v346_v10 = vadd.f32 %v345_v0, %v334_v5  ;;  %v312_v30 = vmul.f32 %v311_v32, %v274_v57  ;;  %v411_v58 = vmul.f32 %v651_v55, %v291_v21  ;;  %v657_v57 = vld [vmem:[%s901_s2 + $0x1f] ss:$0 sm:$0xff] }
  0xed   :  { %v358_v17 = vadd.f32 %v357_v6, %v346_v10  ;;  %v317_v50 = vadd.f32 %v650_v46, %v312_v30 }
  0xef   :  { %v370_v13 = vadd.f32 %v369_v11, %v358_v17  ;;  %v328_v51 = vadd.f32 %v327_v41, %v317_v50  ;;  %v660_v11 = vld [vmem:[%s901_s2 + $0x41] ss:$0 sm:$0xff] }
  0xf1   :  { %v382_v24 = vadd.f32 %v381_v18, %v370_v13  ;;  %v340_v52 = vadd.f32 %v339_v42, %v328_v51 }
  0xf3   :  { %v394_v25 = vadd.f32 %v393_v20, %v382_v24  ;;  %v352_v53 = vadd.f32 %v351_v43, %v340_v52 }
  0xf5   :  { %v406_v45 = vadd.f32 %v405_v26, %v394_v25  ;;  %v364_v54 = vadd.f32 %v363_v47, %v352_v53 }
  0xf7   :  { %v418_v16 = vadd.f32 %v417_v31, %v406_v45  ;;  %v376_v56 = vadd.f32 %v375_v48, %v364_v54 }
  0xf9   :  { %v420_v44 = vsel %vm419_vm8, %v418_v16, 0.0  ;;  %v388_v59 = vadd.f32 %v387_v29, %v376_v56 }
  0xfa   :  { %421 = vadd.xlane.f32.xlu0 %v420_v44 }
  0xfb   :  { %v400_v60 = vadd.f32 %v399_v49, %v388_v59 }
  0xfd   :  { %v412_v61 = vadd.f32 %v411_v58, %v400_v60 }
  0xff   :  { %v428_v20 = vsub.f32 0.0, %v412_v61 }
 0x101   :  { %v429_v28 = vmul.f32 1.442695, %v428_v20 }
 0x187   :  { %v422_v4 = vpop.xlane.xlu0 %421 }
 0x188   :  { %v427_v5 = vadd.f32 %v653_v3, %v422_v4 }
 0x18a   :  { %v434_v6 = vsub.f32 0.0, %v427_v5 }
 0x18c   :  { %v435_v7 = vmul.f32 1.442695, %v434_v6 }
 0x18e   :  { %723 = vpow2.f32 %v435_v7 }
 0x198   :  { %v724_v8 = vpop.eup %723 }
 0x199   :  { %v437_v9 = vadd.f32 1.0, %v724_v8 }
 0x19b   :  { %725 = vrcp.f32 %v437_v9 }
 0x1a5   :  { %v726_v10 = vpop.eup %725 }
 0x1a6   :  { %623 = vrot.lane.b32.xlu1 %v726_v10, %s745_s21 }
 0x1b2   :  { %v598_v62 = vpop.f32.mrb[0].mxu1 }
 0x1b3   :  { %v599_v36 = vadd.f32 %v657_v57, %v598_v62  ;;  %v686_v63 = vpop.f32.mrb[1].mxu1 }
 0x1b5   :  { %v602_v0 = vmax.f32 %v599_v36, 0.0 }
 0x1b7   :  { %v607_v1 = vmul.f32 %v659_v22, %v602_v0 }
 0x1b9   :  { %v608_v2 = vsel %vm528_vm13, %v607_v1, 0.0 }
 0x1ba   :  { %609 = vadd.xlane.f32.xlu0 %v608_v2 }
 0x218   :  { %v624_v24 = vpop.permute.xlu1 %623 }
 0x247   :  { %v610_v14 = vpop.xlane.xlu0 %609 }
 0x248   :  { %v615_v12 = vadd.f32 %v660_v11, %v610_v14 }
 0x24a   :  { %v616_v15 = vsub.f32 0.0, %v615_v12 }
 0x24c   :  { %v617_v17 = vmul.f32 1.442695, %v616_v15 }
 0x24e   :  { %727 = vpow2.f32 %v617_v17 }
 0x258   :  { %v728_v18 = vpop.eup %727 }
 0x259   :  { %v619_v19 = vadd.f32 1.0, %v728_v18 }
 0x25b   :  { %729 = vrcp.f32 %v619_v19 }
 0x25c   :  { %731 = vpow2.f32 %v429_v28 }
 0x265   :  { %v730_v13 = vpop.eup %729 }
 0x266   :  { %627 = vrot.lane.b32.xlu1 %v730_v13, %s746_s24  ;;  %v732_v21 = vpop.eup %731 }
 0x267   :  { %v431_v23 = vadd.f32 1.0, %v732_v21 }
 0x269   :  { %733 = vrcp.f32 %v431_v23 }
 0x273   :  { %v734_v25 = vpop.eup %733 }
 0x274   :  { %v630_v26 = vsel %vm419_vm8, %v734_v25, %v624_v24 }
 0x2d8   :  { %v628_v27 = vpop.permute.xlu1 %627 }
 0x2d9   :  { %v632_v31 = vsel %vm631_vm9, %v630_v26, %v628_v27 }
 0x2da   :  { %v634_v32 = vsel %vm633_vm10, %v632_v31, 0.0 }
 0x2db   :  { %635 = vst.msk [vmem:[%s904_s3] sm:$0xff] %vm528_vm13, %v634_v32 }

</bundles_post_ra>
